<compile_context>
chip_gen: v7x
topology: tpu7x:2x2x1
jax: 0.10.0
libtpu: 0.0.40
codegen_flags: <defaults>
</compile_context>

<pallas_src>
import functools

import numpy as np
import jax
import jax.numpy as jnp
from jax import lax
from jax.experimental import pallas as pl
from jax.experimental.pallas import tpu as pltpu


def _css_kernel(src_ref, w_ref, b_ref, out_ref, h_ref):
    """Whole forward pass in one kernel (tiny shapes; everything resident in VMEM).

    src_ref : (B, T, D) f32
    w_ref   : (max(D,H), 7H + D) f32 packed weight slab, columns:
              [ wl_out(D,3H) | ws_in(D,H) | ws_prev(D,H) | w1s(H,H) | w1l(H,H) | w2(H,D) ]
    b_ref   : (1, 3H + D) f32 packed bias slab: [ b_long(H) | b_short(H) | b_dec1(H) | b_dec2(D) ]
    out_ref : (B, max_len, D) f32  (PyTorch layout — no wrapper transpose)
    h_ref   : (max_len, B, H) f32 scratch: decoder hidden states h_t, rows 1..max_len-1
    """
    B, T, D = src_ref.shape
    max_len = out_ref.shape[1]
    H = (b_ref.shape[-1] - D) // 3
    f32, bf16 = jnp.float32, jnp.bfloat16

    if max_len < 2:                       # degenerate: eval branch leaves all-zero outputs
        out_ref[...] = jnp.zeros(out_ref.shape, f32)
        return

    # ---- static column offsets into the packed slabs ----
    c0 = 0
    c1 = c0 + 3 * H                       # wl_out
    c2 = c1 + H                           # ws_in
    c3 = c2 + H                           # ws_prev
    c4 = c3 + H                           # w1s
    c5 = c4 + H                           # w1l
    c6 = c5 + D                           # w2

    wl_out  = w_ref[0:D, c0:c1]           # (D, 3H) long-term taps stacked on OUTPUT dim
    ws_in   = w_ref[0:D, c1:c2]           # (D, H)
    ws_prev = w_ref[0:D, c2:c3]           # (D, H)
    w1s     = w_ref[0:H, c3:c4]           # (H, H)
    w1l     = w_ref[0:H, c4:c5]           # (H, H)
    w2      = w_ref[0:H, c5:c6]           # (H, D)

    bl = b_ref[:, 0:H]
    bs = b_ref[:, H:2 * H]
    b1 = b_ref[:, 2 * H:3 * H]
    b2 = b_ref[:, 3 * H:3 * H + D]

    src = src_ref[...]

    # ---- long-term encoder (prologue, off the serialized recurrence) ----
    # One matmul on raw src with taps stacked along the output dim (lane-dense RHS),
    # then add the three time-shifted H-slices, ReLU, mean over time.
    c_all = jnp.einsum("btd,dk->btk", src, wl_out, preferred_element_type=f32)  # (B,T,3H)
    csum = (c_all[:, 0:T - 2, 0:H]
            + c_all[:, 1:T - 1, H:2 * H]
            + c_all[:, 2:T, 2 * H:3 * H] + bl)
    z_le = jnp.mean(jnp.maximum(csum, 0.0), axis=1)                             # (B, H)

    # ---- loop-invariant algebra (prologue) ----
    # Fold w2 into the next step's short-term encoder so the recurrence runs in
    # hidden space:  o_{t-k} @ Ws_* = h_{t-k} @ (w2 @ Ws_*) + b2 @ Ws_*.
    W_in   = jnp.dot(w2, ws_in,   preferred_element_type=f32)                   # (H, H)
    W_prev = jnp.dot(w2, ws_prev, preferred_element_type=f32)                   # (H, H)
    b_in   = jnp.dot(b2, ws_in,   preferred_element_type=f32)                   # (1, H)
    b_prev = jnp.dot(b2, ws_prev, preferred_element_type=f32)                   # (1, H)

    # biases broadcast ONCE (no per-iter broadcast_in_dim)
    bs_b      = jnp.broadcast_to(bs, (B, H))                                    # t = 1
    bs_prev_b = jnp.broadcast_to(bs + b_prev, (B, H))                           # t = 2 (inp = 0)
    bs_full_b = jnp.broadcast_to(bs + b_prev + b_in, (B, H))                    # t >= 3
    b1_eff = jnp.dot(z_le, w1l, preferred_element_type=f32) + b1                # (B, H)

    # bf16 operands for the serialized per-step MXU dots (f32 accumulation;
    # ReLU / bias adds stay f32).
    ws_in_bf  = ws_in.astype(bf16)
    w1s_bf    = w1s.astype(bf16)
    W_in_bf   = W_in.astype(bf16)
    W_prev_bf = W_prev.astype(bf16)

    # ---- t = 1 (peeled): inp = src[:, -1], prev = outputs[:, 0] = 0 ----
    z1 = jnp.maximum(
        jnp.dot(src[:, T - 1, :].astype(bf16), ws_in_bf,
                preferred_element_type=f32) + bs_b, 0.0)
    h1 = jnp.maximum(
        jnp.dot(z1.astype(bf16), w1s_bf, preferred_element_type=f32) + b1_eff, 0.0)
    h_ref[1] = h1
    h1_bf = h1.astype(bf16)

    if max_len > 2:
        # ---- t = 2 (peeled): inp = outputs[:, 0] = 0, prev = o_1 ----
        z2 = jnp.maximum(
            jnp.dot(h1_bf, W_prev_bf, preferred_element_type=f32) + bs_prev_b, 0.0)
        h2 = jnp.maximum(
            jnp.dot(z2.astype(bf16), w1s_bf, preferred_element_type=f32) + b1_eff, 0.0)
        h_ref[2] = h2

        if max_len > 3:
            # ---- steady state t >= 3: 2 serialized dots / step, carried in registers;
            # the two short-term dots are independent MXU pushes (v7x MRB can
            # accumulate the second one in place).
            def body(t, carry):
                p1_bf, p2_bf = carry                     # h_{t-1}, h_{t-2} (bf16)
                z = jnp.maximum(
                    jnp.dot(p2_bf, W_in_bf, preferred_element_type=f32)
                    + jnp.dot(p1_bf, W_prev_bf, preferred_element_type=f32)
                    + bs_full_b, 0.0)
                h = jnp.maximum(
                    jnp.dot(z.astype(bf16), w1s_bf, preferred_element_type=f32)
                    + b1_eff, 0.0)
                h_ref[t] = h                             # write-only; never reloaded in-loop
                return (h.astype(bf16), p1_bf)

            trip = max_len - 3
            lax.fori_loop(3, max_len, body, (h2.astype(bf16), h1_bf),
                          unroll=min(8, trip))           # bounded unroll for long max_len

    # ---- epilogue: ONE batched output projection over all timesteps ----
    h_bt = jnp.transpose(h_ref[1:], (1, 0, 2))                                  # (B, L-1, H)
    o_bt = jnp.einsum("bth,hd->btd", h_bt, w2, preferred_element_type=f32) + b2 # (B, L-1, D)
    out_ref[...] = jnp.concatenate(
        [jnp.zeros((B, 1, D), f32), o_bt], axis=1)       # outputs[:, 0] stays exactly 0


@functools.partial(jax.jit, static_argnames=("max_len",))
def conv_seq2seq_forward(src, tgt, params, max_len=None):
    """Wrapper: (B, T, D) src/tgt -> (B, max_len, D) outputs, eval-mode semantics.

    All weight packing/reshapes live inside the jit so they fuse with the call
    instead of becoming separate per-call XLA ops; the kernel gets 3 inputs total.
    """
    B, T, D = src.shape
    max_len = tgt.shape[1] if max_len is None else max_len
    if T <= 2:
        raise ValueError("convSeq2Seq long-term encoder requires seq_len > 2")
    H = params["b_dec1"].shape[-1]

    rows = max(D, H)

    def pad_rows(w):
        w = w.astype(jnp.float32)
        return jnp.pad(w, ((0, rows - w.shape[0]), (0, 0)))

    # long-term conv taps stacked along the OUTPUT dim -> (D, 3H)
    wl_out = jnp.swapaxes(params["w_long"], 0, 1).reshape(D, 3 * H)
    w_slab = jnp.concatenate(
        [pad_rows(wl_out),
         pad_rows(params["w_short"][0]), pad_rows(params["w_short"][1]),
         pad_rows(params["w_dec1_s"]), pad_rows(params["w_dec1_l"]),
         pad_rows(params["w_dec2"])], axis=1)                       # (rows, 7H + D)
    b_slab = jnp.concatenate(
        [params["b_long"], params["b_short"], params["b_dec1"],
         params["b_dec2"]], axis=-1).astype(jnp.float32)            # (1, 3H + D)

    vmem = pl.BlockSpec(memory_space=pltpu.MemorySpace.VMEM)
    return pl.pallas_call(
        _css_kernel,
        out_shape=jax.ShapeDtypeStruct((B, max_len, D), jnp.float32),
        in_specs=[vmem, vmem, vmem],
        out_specs=vmem,
        scratch_shapes=[pltpu.VMEM((max_len, B, H), jnp.float32)],  # hidden-state stack
        # ~30 KiB total footprint: harmless on all gens (v7x has 64 MiB physical VMEM).
        compiler_params=pltpu.CompilerParams(vmem_limit_bytes=32 * 1024 * 1024),
    )(src.astype(jnp.float32), w_slab, b_slab)


def _reference(src, tgt, p, max_len=None):
    """Pure-JAX f32 reference mirroring the PyTorch eval-mode forward."""
    B, T, D = src.shape
    max_len = tgt.shape[1] if max_len is None else max_len
    H = p["b_long"].shape[-1]
    acc = jnp.zeros((B, H), jnp.float32)
    for q in range(T - 2):
        c = (src[:, q] @ p["w_long"][0] + src[:, q + 1] @ p["w_long"][1]
             + src[:, q + 2] @ p["w_long"][2] + p["b_long"])
        acc = acc + jnp.maximum(c, 0.0)
    z_le = acc / (T - 2)
    outputs = jnp.zeros((B, max_len, D), jnp.float32)
    for t in range(1, max_len):
        inp = src[:, -1] if t < 2 else outputs[:, t - 2]
        prev = outputs[:, t - 1]
        z_s = jnp.maximum(inp @ p["w_short"][0] + prev @ p["w_short"][1] + p["b_short"], 0.0)
        h = jnp.maximum(z_s @ p["w_dec1_s"] + z_le @ p["w_dec1_l"] + p["b_dec1"], 0.0)
        o = h @ p["w_dec2"] + p["b_dec2"]
        outputs = outputs.at[:, t].set(o)
    return outputs


def init_params(key, input_dim, hidden_dim):
    """Deterministic init, matching init_weights(): uniform(-0.08, 0.08)."""
    D, H = input_dim, hidden_dim
    shapes = {
        "w_long":  (3, D, H), "b_long":  (1, H),
        "w_short": (2, D, H), "b_short": (1, H),
        "w_dec1_s": (H, H), "w_dec1_l": (H, H), "b_dec1": (1, H),
        "w_dec2": (H, D), "b_dec2": (1, D),
    }
    params = {}
    for name, shape in sorted(shapes.items()):
        key, sub = jax.random.split(key)
        params[name] = jax.random.uniform(sub, shape, jnp.float32, -0.08, 0.08)
    return params


if __name__ == "__main__":
    B, T, D, H = 2, 8, 16, 32           # batch, seq_len, input_dim, hidden_dim
    key = jax.random.PRNGKey(0)
    k_src, k_tgt, k_par = jax.random.split(key, 3)
    src = jax.random.normal(k_src, (B, T, D), jnp.float32)
    tgt = jax.random.normal(k_tgt, (B, T, D), jnp.float32)
    params = init_params(k_par, D, H)

    out = conv_seq2seq_forward(src, tgt, params)
    out = jax.block_until_ready(out)

    ref = _reference(src, tgt, params)
    # Tolerance: model was already downgraded from f64; the per-step dots use bf16
    # MXU operands with f32 accumulation (review-sanctioned), so allow ~1e-2 rel.
    np.testing.assert_allclose(np.asarray(out), np.asarray(ref), rtol=2e-2, atol=2e-3)
    assert out.shape == (B, tgt.shape[1], D)
    print("KERNEL_OK")
</pallas_src>

<mosaic_0001>
module attributes {stable_mosaic.version = 11 : i64} {
  func.func @_css_kernel(%arg0: memref<2x8x16xf32, #tpu.memory_space<vmem>>, %arg1: memref<32x240xf32, #tpu.memory_space<vmem>>, %arg2: memref<1x112xf32, #tpu.memory_space<vmem>>, %arg3: memref<2x8x16xf32, #tpu.memory_space<vmem>>, %arg4: memref<8x2x32xf32, #tpu.memory_space<vmem>>) attributes {dimension_semantics = [], scalar_prefetch = 0 : i64, scratch_operands = 1 : i64, tpu.core_type = #tpu.core_type<tc>} {
    %c0 = arith.constant 0 : index
    %c0_0 = arith.constant 0 : index
    %0 = vector.load %arg1[%c0, %c0_0] : memref<32x240xf32, #tpu.memory_space<vmem>>, vector<16x96xf32>
    %c0_1 = arith.constant 0 : index
    %c96 = arith.constant 96 : index
    %1 = vector.load %arg1[%c0_1, %c96] : memref<32x240xf32, #tpu.memory_space<vmem>>, vector<16x32xf32>
    %c0_2 = arith.constant 0 : index
    %c128 = arith.constant 128 : index
    %2 = vector.load %arg1[%c0_2, %c128] : memref<32x240xf32, #tpu.memory_space<vmem>>, vector<16x32xf32>
    %c0_3 = arith.constant 0 : index
    %c160 = arith.constant 160 : index
    %3 = vector.load %arg1[%c0_3, %c160] : memref<32x240xf32, #tpu.memory_space<vmem>>, vector<32x32xf32>
    %c0_4 = arith.constant 0 : index
    %c192 = arith.constant 192 : index
    %4 = vector.load %arg1[%c0_4, %c192] : memref<32x240xf32, #tpu.memory_space<vmem>>, vector<32x32xf32>
    %c0_5 = arith.constant 0 : index
    %c224 = arith.constant 224 : index
    %5 = vector.load %arg1[%c0_5, %c224] : memref<32x240xf32, #tpu.memory_space<vmem>>, vector<32x16xf32>
    %c0_6 = arith.constant 0 : index
    %c0_7 = arith.constant 0 : index
    %6 = vector.load %arg2[%c0_6, %c0_7] : memref<1x112xf32, #tpu.memory_space<vmem>>, vector<1x32xf32>
    %c0_8 = arith.constant 0 : index
    %c32 = arith.constant 32 : index
    %7 = vector.load %arg2[%c0_8, %c32] : memref<1x112xf32, #tpu.memory_space<vmem>>, vector<1x32xf32>
    %c0_9 = arith.constant 0 : index
    %c64 = arith.constant 64 : index
    %8 = vector.load %arg2[%c0_9, %c64] : memref<1x112xf32, #tpu.memory_space<vmem>>, vector<1x32xf32>
    %c0_10 = arith.constant 0 : index
    %c96_11 = arith.constant 96 : index
    %9 = vector.load %arg2[%c0_10, %c96_11] : memref<1x112xf32, #tpu.memory_space<vmem>>, vector<1x16xf32>
    %c0_12 = arith.constant 0 : index
    %c0_13 = arith.constant 0 : index
    %c0_14 = arith.constant 0 : index
    %10 = vector.load %arg0[%c0_12, %c0_13, %c0_14] : memref<2x8x16xf32, #tpu.memory_space<vmem>>, vector<2x8x16xf32>
    "tpu.trace_start"() <{level = 10 : i32, message = "btd,dk->btk"}> : () -> ()
    %cst = arith.constant dense<0.000000e+00> : vector<2x8x96xf32>
    %11 = tpu.matmul %10, %0, %cst {dimension_numbers = #tpu.dot_dimension_numbers<[2], [0], [0, 1], [1], [0, 0, 0, 1, 1, 1], [], []>} : vector<2x8x16xf32>, vector<16x96xf32>, vector<2x8x96xf32> -> vector<2x8x96xf32>
    "tpu.trace_stop"() : () -> ()
    %12 = vector.extract_strided_slice %11 {offsets = [0, 0, 0], sizes = [2, 6, 32], strides = [1, 1, 1]} : vector<2x8x96xf32> to vector<2x6x32xf32>
    %13 = vector.extract_strided_slice %11 {offsets = [0, 1, 32], sizes = [2, 6, 32], strides = [1, 1, 1]} : vector<2x8x96xf32> to vector<2x6x32xf32>
    %14 = arith.addf %12, %13 : vector<2x6x32xf32>
    %15 = vector.extract_strided_slice %11 {offsets = [0, 2, 64], sizes = [2, 6, 32], strides = [1, 1, 1]} : vector<2x8x96xf32> to vector<2x6x32xf32>
    %16 = arith.addf %14, %15 : vector<2x6x32xf32>
    %17 = vector.shape_cast %6 : vector<1x32xf32> to vector<1x1x32xf32>
    %18 = vector.broadcast %17 : vector<1x1x32xf32> to vector<2x6x32xf32>
    %19 = arith.addf %16, %18 : vector<2x6x32xf32>
    %cst_15 = arith.constant 0.000000e+00 : f32
    %20 = vector.broadcast %cst_15 : f32 to vector<2x6x32xf32>
    %21 = arith.maximumf %19, %20 : vector<2x6x32xf32>
    %cst_16 = arith.constant dense<0.000000e+00> : vector<2x32xf32>
    %22 = vector.multi_reduction <add>, %21, %cst_16 [1] : vector<2x6x32xf32> to vector<2x32xf32>
    %cst_17 = arith.constant 6.000000e+00 : f32
    %23 = vector.broadcast %cst_17 : f32 to vector<2x32xf32>
    %24 = arith.divf %22, %23 : vector<2x32xf32>
    %cst_18 = arith.constant dense<0.000000e+00> : vector<32x32xf32>
    %25 = tpu.matmul %5, %1, %cst_18 {dimension_numbers = #tpu.dot_dimension_numbers<[1], [0], [0], [1], [0, 0, 1, 1], [], []>} : vector<32x16xf32>, vector<16x32xf32>, vector<32x32xf32> -> vector<32x32xf32>
    %cst_19 = arith.constant dense<0.000000e+00> : vector<32x32xf32>
    %26 = tpu.matmul %5, %2, %cst_19 {dimension_numbers = #tpu.dot_dimension_numbers<[1], [0], [0], [1], [0, 0, 1, 1], [], []>} : vector<32x16xf32>, vector<16x32xf32>, vector<32x32xf32> -> vector<32x32xf32>
    %cst_20 = arith.constant dense<0.000000e+00> : vector<1x32xf32>
    %27 = tpu.matmul %9, %1, %cst_20 {dimension_numbers = #tpu.dot_dimension_numbers<[1], [0], [0], [1], [0, 0, 1, 1], [], []>} : vector<1x16xf32>, vector<16x32xf32>, vector<1x32xf32> -> vector<1x32xf32>
    %cst_21 = arith.constant dense<0.000000e+00> : vector<1x32xf32>
    %28 = tpu.matmul %9, %2, %cst_21 {dimension_numbers = #tpu.dot_dimension_numbers<[1], [0], [0], [1], [0, 0, 1, 1], [], []>} : vector<1x16xf32>, vector<16x32xf32>, vector<1x32xf32> -> vector<1x32xf32>
    %29 = vector.shape_cast %7 : vector<1x32xf32> to vector<1x32xf32>
    %30 = vector.broadcast %29 : vector<1x32xf32> to vector<2x32xf32>
    %31 = arith.addf %7, %28 : vector<1x32xf32>
    %32 = vector.shape_cast %31 : vector<1x32xf32> to vector<1x32xf32>
    %33 = vector.broadcast %32 : vector<1x32xf32> to vector<2x32xf32>
    %34 = arith.addf %7, %28 : vector<1x32xf32>
    %35 = arith.addf %34, %27 : vector<1x32xf32>
    %36 = vector.shape_cast %35 : vector<1x32xf32> to vector<1x32xf32>
    %37 = vector.broadcast %36 : vector<1x32xf32> to vector<2x32xf32>
    %cst_22 = arith.constant dense<0.000000e+00> : vector<2x32xf32>
    %38 = tpu.matmul %24, %4, %cst_22 {dimension_numbers = #tpu.dot_dimension_numbers<[1], [0], [0], [1], [0, 0, 1, 1], [], []>} : vector<2x32xf32>, vector<32x32xf32>, vector<2x32xf32> -> vector<2x32xf32>
    %39 = vector.broadcast %8 : vector<1x32xf32> to vector<2x32xf32>
    %40 = arith.addf %38, %39 : vector<2x32xf32>
    %41 = arith.truncf %1 : vector<16x32xf32> to vector<16x32xbf16>
    %42 = arith.truncf %3 : vector<32x32xf32> to vector<32x32xbf16>
    %43 = arith.truncf %25 : vector<32x32xf32> to vector<32x32xbf16>
    %44 = arith.truncf %26 : vector<32x32xf32> to vector<32x32xbf16>
    %45 = vector.extract_strided_slice %10 {offsets = [0, 7, 0], sizes = [2, 1, 16], strides = [1, 1, 1]} : vector<2x8x16xf32> to vector<2x1x16xf32>
    %46 = vector.shape_cast %45 : vector<2x1x16xf32> to vector<2x16xf32>
    %47 = arith.truncf %46 : vector<2x16xf32> to vector<2x16xbf16>
    %cst_23 = arith.constant dense<0.000000e+00> : vector<2x32xf32>
    %48 = tpu.matmul %47, %41, %cst_23 {dimension_numbers = #tpu.dot_dimension_numbers<[1], [0], [0], [1], [0, 0, 1, 1], [], []>} : vector<2x16xbf16>, vector<16x32xbf16>, vector<2x32xf32> -> vector<2x32xf32>
    %49 = arith.addf %48, %30 : vector<2x32xf32>
    %cst_24 = arith.constant 0.000000e+00 : f32
    %50 = vector.broadcast %cst_24 : f32 to vector<2x32xf32>
    %51 = arith.maximumf %49, %50 : vector<2x32xf32>
    %52 = arith.truncf %51 : vector<2x32xf32> to vector<2x32xbf16>
    %cst_25 = arith.constant dense<0.000000e+00> : vector<2x32xf32>
    %53 = tpu.matmul %52, %42, %cst_25 {dimension_numbers = #tpu.dot_dimension_numbers<[1], [0], [0], [1], [0, 0, 1, 1], [], []>} : vector<2x32xbf16>, vector<32x32xbf16>, vector<2x32xf32> -> vector<2x32xf32>
    %54 = arith.addf %53, %40 : vector<2x32xf32>
    %cst_26 = arith.constant 0.000000e+00 : f32
    %55 = vector.broadcast %cst_26 : f32 to vector<2x32xf32>
    %56 = arith.maximumf %54, %55 : vector<2x32xf32>
    %c1 = arith.constant 1 : index
    %c0_27 = arith.constant 0 : index
    %c0_28 = arith.constant 0 : index
    %57 = vector.load %arg4[%c1, %c0_27, %c0_28] : memref<8x2x32xf32, #tpu.memory_space<vmem>>, vector<1x2x32xf32>
    %58 = vector.shape_cast %57 : vector<1x2x32xf32> to vector<2x32xf32>
    %59 = vector.shape_cast %56 : vector<2x32xf32> to vector<1x2x32xf32>
    tpu.vector_store %arg4[%c1, %c0_27, %c0_28], %59 {strides = array<i32>} : memref<8x2x32xf32, #tpu.memory_space<vmem>>, vector<1x2x32xf32>,
    %60 = arith.truncf %56 : vector<2x32xf32> to vector<2x32xbf16>
    %cst_29 = arith.constant dense<0.000000e+00> : vector<2x32xf32>
    %61 = tpu.matmul %60, %44, %cst_29 {dimension_numbers = #tpu.dot_dimension_numbers<[1], [0], [0], [1], [0, 0, 1, 1], [], []>} : vector<2x32xbf16>, vector<32x32xbf16>, vector<2x32xf32> -> vector<2x32xf32>
    %62 = arith.addf %61, %33 : vector<2x32xf32>
    %cst_30 = arith.constant 0.000000e+00 : f32
    %63 = vector.broadcast %cst_30 : f32 to vector<2x32xf32>
    %64 = arith.maximumf %62, %63 : vector<2x32xf32>
    %65 = arith.truncf %64 : vector<2x32xf32> to vector<2x32xbf16>
    %cst_31 = arith.constant dense<0.000000e+00> : vector<2x32xf32>
    %66 = tpu.matmul %65, %42, %cst_31 {dimension_numbers = #tpu.dot_dimension_numbers<[1], [0], [0], [1], [0, 0, 1, 1], [], []>} : vector<2x32xbf16>, vector<32x32xbf16>, vector<2x32xf32> -> vector<2x32xf32>
    %67 = arith.addf %66, %40 : vector<2x32xf32>
    %cst_32 = arith.constant 0.000000e+00 : f32
    %68 = vector.broadcast %cst_32 : f32 to vector<2x32xf32>
    %69 = arith.maximumf %67, %68 : vector<2x32xf32>
    %c2 = arith.constant 2 : index
    %c0_33 = arith.constant 0 : index
    %c0_34 = arith.constant 0 : index
    %70 = vector.load %arg4[%c2, %c0_33, %c0_34] : memref<8x2x32xf32, #tpu.memory_space<vmem>>, vector<1x2x32xf32>
    %71 = vector.shape_cast %70 : vector<1x2x32xf32> to vector<2x32xf32>
    %72 = vector.shape_cast %69 : vector<2x32xf32> to vector<1x2x32xf32>
    tpu.vector_store %arg4[%c2, %c0_33, %c0_34], %72 {strides = array<i32>} : memref<8x2x32xf32, #tpu.memory_space<vmem>>, vector<1x2x32xf32>,
    %73 = arith.truncf %69 : vector<2x32xf32> to vector<2x32xbf16>
    %c3_i32 = arith.constant 3 : i32
    %cst_35 = arith.constant dense<0.000000e+00> : vector<2x32xf32>
    %74 = tpu.matmul %60, %43, %cst_35 {dimension_numbers = #tpu.dot_dimension_numbers<[1], [0], [0], [1], [0, 0, 1, 1], [], []>} : vector<2x32xbf16>, vector<32x32xbf16>, vector<2x32xf32> -> vector<2x32xf32>
    %cst_36 = arith.constant dense<0.000000e+00> : vector<2x32xf32>
    %75 = tpu.matmul %73, %44, %cst_36 {dimension_numbers = #tpu.dot_dimension_numbers<[1], [0], [0], [1], [0, 0, 1, 1], [], []>} : vector<2x32xbf16>, vector<32x32xbf16>, vector<2x32xf32> -> vector<2x32xf32>
    %76 = arith.addf %74, %75 : vector<2x32xf32>
    %77 = arith.addf %76, %37 : vector<2x32xf32>
    %cst_37 = arith.constant 0.000000e+00 : f32
    %78 = vector.broadcast %cst_37 : f32 to vector<2x32xf32>
    %79 = arith.maximumf %77, %78 : vector<2x32xf32>
    %80 = arith.truncf %79 : vector<2x32xf32> to vector<2x32xbf16>
    %cst_38 = arith.constant dense<0.000000e+00> : vector<2x32xf32>
    %81 = tpu.matmul %80, %42, %cst_38 {dimension_numbers = #tpu.dot_dimension_numbers<[1], [0], [0], [1], [0, 0, 1, 1], [], []>} : vector<2x32xbf16>, vector<32x32xbf16>, vector<2x32xf32> -> vector<2x32xf32>
    %82 = arith.addf %81, %40 : vector<2x32xf32>
    %cst_39 = arith.constant 0.000000e+00 : f32
    %83 = vector.broadcast %cst_39 : f32 to vector<2x32xf32>
    %84 = arith.maximumf %82, %83 : vector<2x32xf32>
    %85 = arith.index_cast %c3_i32 : i32 to index
    %c0_40 = arith.constant 0 : index
    %c0_41 = arith.constant 0 : index
    %86 = vector.load %arg4[%85, %c0_40, %c0_41] : memref<8x2x32xf32, #tpu.memory_space<vmem>>, vector<1x2x32xf32>
    %87 = vector.shape_cast %86 : vector<1x2x32xf32> to vector<2x32xf32>
    %88 = vector.shape_cast %84 : vector<2x32xf32> to vector<1x2x32xf32>
    tpu.vector_store %arg4[%85, %c0_40, %c0_41], %88 {strides = array<i32>} : memref<8x2x32xf32, #tpu.memory_space<vmem>>, vector<1x2x32xf32>,
    %89 = arith.truncf %84 : vector<2x32xf32> to vector<2x32xbf16>
    %c4_i32 = arith.constant 4 : i32
    %cst_42 = arith.constant dense<0.000000e+00> : vector<2x32xf32>
    %90 = tpu.matmul %73, %43, %cst_42 {dimension_numbers = #tpu.dot_dimension_numbers<[1], [0], [0], [1], [0, 0, 1, 1], [], []>} : vector<2x32xbf16>, vector<32x32xbf16>, vector<2x32xf32> -> vector<2x32xf32>
    %cst_43 = arith.constant dense<0.000000e+00> : vector<2x32xf32>
    %91 = tpu.matmul %89, %44, %cst_43 {dimension_numbers = #tpu.dot_dimension_numbers<[1], [0], [0], [1], [0, 0, 1, 1], [], []>} : vector<2x32xbf16>, vector<32x32xbf16>, vector<2x32xf32> -> vector<2x32xf32>
    %92 = arith.addf %90, %91 : vector<2x32xf32>
    %93 = arith.addf %92, %37 : vector<2x32xf32>
    %cst_44 = arith.constant 0.000000e+00 : f32
    %94 = vector.broadcast %cst_44 : f32 to vector<2x32xf32>
    %95 = arith.maximumf %93, %94 : vector<2x32xf32>
    %96 = arith.truncf %95 : vector<2x32xf32> to vector<2x32xbf16>
    %cst_45 = arith.constant dense<0.000000e+00> : vector<2x32xf32>
    %97 = tpu.matmul %96, %42, %cst_45 {dimension_numbers = #tpu.dot_dimension_numbers<[1], [0], [0], [1], [0, 0, 1, 1], [], []>} : vector<2x32xbf16>, vector<32x32xbf16>, vector<2x32xf32> -> vector<2x32xf32>
    %98 = arith.addf %97, %40 : vector<2x32xf32>
    %cst_46 = arith.constant 0.000000e+00 : f32
    %99 = vector.broadcast %cst_46 : f32 to vector<2x32xf32>
    %100 = arith.maximumf %98, %99 : vector<2x32xf32>
    %101 = arith.index_cast %c4_i32 : i32 to index
    %c0_47 = arith.constant 0 : index
    %c0_48 = arith.constant 0 : index
    %102 = vector.load %arg4[%101, %c0_47, %c0_48] : memref<8x2x32xf32, #tpu.memory_space<vmem>>, vector<1x2x32xf32>
    %103 = vector.shape_cast %102 : vector<1x2x32xf32> to vector<2x32xf32>
    %104 = vector.shape_cast %100 : vector<2x32xf32> to vector<1x2x32xf32>
    tpu.vector_store %arg4[%101, %c0_47, %c0_48], %104 {strides = array<i32>} : memref<8x2x32xf32, #tpu.memory_space<vmem>>, vector<1x2x32xf32>,
    %105 = arith.truncf %100 : vector<2x32xf32> to vector<2x32xbf16>
    %c5_i32 = arith.constant 5 : i32
    %cst_49 = arith.constant dense<0.000000e+00> : vector<2x32xf32>
    %106 = tpu.matmul %89, %43, %cst_49 {dimension_numbers = #tpu.dot_dimension_numbers<[1], [0], [0], [1], [0, 0, 1, 1], [], []>} : vector<2x32xbf16>, vector<32x32xbf16>, vector<2x32xf32> -> vector<2x32xf32>
    %cst_50 = arith.constant dense<0.000000e+00> : vector<2x32xf32>
    %107 = tpu.matmul %105, %44, %cst_50 {dimension_numbers = #tpu.dot_dimension_numbers<[1], [0], [0], [1], [0, 0, 1, 1], [], []>} : vector<2x32xbf16>, vector<32x32xbf16>, vector<2x32xf32> -> vector<2x32xf32>
    %108 = arith.addf %106, %107 : vector<2x32xf32>
    %109 = arith.addf %108, %37 : vector<2x32xf32>
    %cst_51 = arith.constant 0.000000e+00 : f32
    %110 = vector.broadcast %cst_51 : f32 to vector<2x32xf32>
    %111 = arith.maximumf %109, %110 : vector<2x32xf32>
    %112 = arith.truncf %111 : vector<2x32xf32> to vector<2x32xbf16>
    %cst_52 = arith.constant dense<0.000000e+00> : vector<2x32xf32>
    %113 = tpu.matmul %112, %42, %cst_52 {dimension_numbers = #tpu.dot_dimension_numbers<[1], [0], [0], [1], [0, 0, 1, 1], [], []>} : vector<2x32xbf16>, vector<32x32xbf16>, vector<2x32xf32> -> vector<2x32xf32>
    %114 = arith.addf %113, %40 : vector<2x32xf32>
    %cst_53 = arith.constant 0.000000e+00 : f32
    %115 = vector.broadcast %cst_53 : f32 to vector<2x32xf32>
    %116 = arith.maximumf %114, %115 : vector<2x32xf32>
    %117 = arith.index_cast %c5_i32 : i32 to index
    %c0_54 = arith.constant 0 : index
    %c0_55 = arith.constant 0 : index
    %118 = vector.load %arg4[%117, %c0_54, %c0_55] : memref<8x2x32xf32, #tpu.memory_space<vmem>>, vector<1x2x32xf32>
    %119 = vector.shape_cast %118 : vector<1x2x32xf32> to vector<2x32xf32>
    %120 = vector.shape_cast %116 : vector<2x32xf32> to vector<1x2x32xf32>
    tpu.vector_store %arg4[%117, %c0_54, %c0_55], %120 {strides = array<i32>} : memref<8x2x32xf32, #tpu.memory_space<vmem>>, vector<1x2x32xf32>,
    %121 = arith.truncf %116 : vector<2x32xf32> to vector<2x32xbf16>
    %c6_i32 = arith.constant 6 : i32
    %cst_56 = arith.constant dense<0.000000e+00> : vector<2x32xf32>
    %122 = tpu.matmul %105, %43, %cst_56 {dimension_numbers = #tpu.dot_dimension_numbers<[1], [0], [0], [1], [0, 0, 1, 1], [], []>} : vector<2x32xbf16>, vector<32x32xbf16>, vector<2x32xf32> -> vector<2x32xf32>
    %cst_57 = arith.constant dense<0.000000e+00> : vector<2x32xf32>
    %123 = tpu.matmul %121, %44, %cst_57 {dimension_numbers = #tpu.dot_dimension_numbers<[1], [0], [0], [1], [0, 0, 1, 1], [], []>} : vector<2x32xbf16>, vector<32x32xbf16>, vector<2x32xf32> -> vector<2x32xf32>
    %124 = arith.addf %122, %123 : vector<2x32xf32>
    %125 = arith.addf %124, %37 : vector<2x32xf32>
    %cst_58 = arith.constant 0.000000e+00 : f32
    %126 = vector.broadcast %cst_58 : f32 to vector<2x32xf32>
    %127 = arith.maximumf %125, %126 : vector<2x32xf32>
    %128 = arith.truncf %127 : vector<2x32xf32> to vector<2x32xbf16>
    %cst_59 = arith.constant dense<0.000000e+00> : vector<2x32xf32>
    %129 = tpu.matmul %128, %42, %cst_59 {dimension_numbers = #tpu.dot_dimension_numbers<[1], [0], [0], [1], [0, 0, 1, 1], [], []>} : vector<2x32xbf16>, vector<32x32xbf16>, vector<2x32xf32> -> vector<2x32xf32>
    %130 = arith.addf %129, %40 : vector<2x32xf32>
    %cst_60 = arith.constant 0.000000e+00 : f32
    %131 = vector.broadcast %cst_60 : f32 to vector<2x32xf32>
    %132 = arith.maximumf %130, %131 : vector<2x32xf32>
    %133 = arith.index_cast %c6_i32 : i32 to index
    %c0_61 = arith.constant 0 : index
    %c0_62 = arith.constant 0 : index
    %134 = vector.load %arg4[%133, %c0_61, %c0_62] : memref<8x2x32xf32, #tpu.memory_space<vmem>>, vector<1x2x32xf32>
    %135 = vector.shape_cast %134 : vector<1x2x32xf32> to vector<2x32xf32>
    %136 = vector.shape_cast %132 : vector<2x32xf32> to vector<1x2x32xf32>
    tpu.vector_store %arg4[%133, %c0_61, %c0_62], %136 {strides = array<i32>} : memref<8x2x32xf32, #tpu.memory_space<vmem>>, vector<1x2x32xf32>,
    %137 = arith.truncf %132 : vector<2x32xf32> to vector<2x32xbf16>
    %c7_i32 = arith.constant 7 : i32
    %cst_63 = arith.constant dense<0.000000e+00> : vector<2x32xf32>
    %138 = tpu.matmul %121, %43, %cst_63 {dimension_numbers = #tpu.dot_dimension_numbers<[1], [0], [0], [1], [0, 0, 1, 1], [], []>} : vector<2x32xbf16>, vector<32x32xbf16>, vector<2x32xf32> -> vector<2x32xf32>
    %cst_64 = arith.constant dense<0.000000e+00> : vector<2x32xf32>
    %139 = tpu.matmul %137, %44, %cst_64 {dimension_numbers = #tpu.dot_dimension_numbers<[1], [0], [0], [1], [0, 0, 1, 1], [], []>} : vector<2x32xbf16>, vector<32x32xbf16>, vector<2x32xf32> -> vector<2x32xf32>
    %140 = arith.addf %138, %139 : vector<2x32xf32>
    %141 = arith.addf %140, %37 : vector<2x32xf32>
    %cst_65 = arith.constant 0.000000e+00 : f32
    %142 = vector.broadcast %cst_65 : f32 to vector<2x32xf32>
    %143 = arith.maximumf %141, %142 : vector<2x32xf32>
    %144 = arith.truncf %143 : vector<2x32xf32> to vector<2x32xbf16>
    %cst_66 = arith.constant dense<0.000000e+00> : vector<2x32xf32>
    %145 = tpu.matmul %144, %42, %cst_66 {dimension_numbers = #tpu.dot_dimension_numbers<[1], [0], [0], [1], [0, 0, 1, 1], [], []>} : vector<2x32xbf16>, vector<32x32xbf16>, vector<2x32xf32> -> vector<2x32xf32>
    %146 = arith.addf %145, %40 : vector<2x32xf32>
    %cst_67 = arith.constant 0.000000e+00 : f32
    %147 = vector.broadcast %cst_67 : f32 to vector<2x32xf32>
    %148 = arith.maximumf %146, %147 : vector<2x32xf32>
    %149 = arith.index_cast %c7_i32 : i32 to index
    %c0_68 = arith.constant 0 : index
    %c0_69 = arith.constant 0 : index
    %150 = vector.load %arg4[%149, %c0_68, %c0_69] : memref<8x2x32xf32, #tpu.memory_space<vmem>>, vector<1x2x32xf32>
    %151 = vector.shape_cast %150 : vector<1x2x32xf32> to vector<2x32xf32>
    %152 = vector.shape_cast %148 : vector<2x32xf32> to vector<1x2x32xf32>
    tpu.vector_store %arg4[%149, %c0_68, %c0_69], %152 {strides = array<i32>} : memref<8x2x32xf32, #tpu.memory_space<vmem>>, vector<1x2x32xf32>,
    %153 = arith.truncf %148 : vector<2x32xf32> to vector<2x32xbf16>
    %c5_i32_70 = arith.constant 5 : i32
    %c1_71 = arith.constant 1 : index
    %c0_72 = arith.constant 0 : index
    %c0_73 = arith.constant 0 : index
    %154 = vector.load %arg4[%c1_71, %c0_72, %c0_73] : memref<8x2x32xf32, #tpu.memory_space<vmem>>, vector<7x2x32xf32>
    %155 = tpu.transpose %154, [1, 0, 2] : vector<7x2x32xf32> -> vector<2x7x32xf32>
    "tpu.trace_start"() <{level = 10 : i32, message = "bth,hd->btd"}> : () -> ()
    %cst_74 = arith.constant dense<0.000000e+00> : vector<2x7x16xf32>
    %156 = tpu.matmul %155, %5, %cst_74 {dimension_numbers = #tpu.dot_dimension_numbers<[2], [0], [0, 1], [1], [0, 0, 0, 1, 1, 1], [], []>} : vector<2x7x32xf32>, vector<32x16xf32>, vector<2x7x16xf32> -> vector<2x7x16xf32>
    "tpu.trace_stop"() : () -> ()
    %157 = vector.shape_cast %9 : vector<1x16xf32> to vector<1x1x16xf32>
    %158 = vector.broadcast %157 : vector<1x1x16xf32> to vector<2x7x16xf32>
    %159 = arith.addf %156, %158 : vector<2x7x16xf32>
    %cst_75 = arith.constant 0.000000e+00 : f32
    %160 = vector.broadcast %cst_75 : f32 to vector<2x1x16xf32>
    %161 = tpu.concatenate %160, %159 in 1 : vector<2x1x16xf32>, vector<2x7x16xf32> -> vector<2x8x16xf32>
    %c0_76 = arith.constant 0 : index
    %c0_77 = arith.constant 0 : index
    %c0_78 = arith.constant 0 : index
    %162 = vector.load %arg3[%c0_76, %c0_77, %c0_78] : memref<2x8x16xf32, #tpu.memory_space<vmem>>, vector<2x8x16xf32>
    tpu.vector_store %arg3[%c0_76, %c0_77, %c0_78], %161 {strides = array<i32>} : memref<2x8x16xf32, #tpu.memory_space<vmem>>, vector<2x8x16xf32>,
    return
  }
}

</mosaic_0001>

<bundles_post_ra>
// kernel: conv_seq2seq_forward.1
= control target key start
LH: loop header
LB: loop body
LE: loop exit
PB: predicated region body
PF: predicated region fallthrough
CT: control target
= control target key end

     0   :  { %vm25_vm0 = vcmask 130048   ;;  %v130_v3 = vlaneseq  ;;  %s2638_s24 = smov 32   ;;  %s3061_s0 = inlined_call_operand.vmem [shape: f32[2,8,16], index: 0, kind: input, shape index: {}]   ;;  %s3062_s1 = inlined_call_operand.vmem [shape: f32[32,240], index: 1, kind: input, shape index: {}]   ;;  %s3063_s2 = inlined_call_operand.vmem [shape: f32[1,112], index: 2, kind: input, shape index: {}]   ;;  %s3064_s3 = inlined_call_operand.hbm [shape: f32[2,8,16], index: 3, kind: output, shape index: {}]  }
   0x1   :  { %v2672_v0 = vld [vmem:[%s3062_s1] sm:$0xff]  ;;  %v2677_v1 = vld [vmem:[%s3062_s1 + $0x10] sm:$0xff]  ;;  %v24_v6 = vld [vmem:[%s3061_s0 + $0x8] sm:$0xff] }
   0x2   :  { %v23_v2 = vld [vmem:[%s3061_s0] sm:$0xff]  ;;  %v2549_v4 = vpack.c.bf16 %v2677_v1, %v2672_v0  ;;  %v2691_v7 = vld [vmem:[%s3062_s1 + $0x8] sm:$0xff]  ;;  %v647_v9 = vpack.c.bf16 %v24_v6, %v24_v6  ;;  %v19_v10 = vld [vmem:[%s3062_s1 + $0x18] sm:$0xff]  ;;  %v2705_v11 = vshrl.u32 %v130_v3, 7 }
   0x3   :  { %2340 = vmatprep.mubr.msk.f32.mxu0 %vm25_vm0, %v23_v2  ;;  %v646_v5 = vpack.c.bf16 %v23_v2, %v23_v2  ;;  %v2696_v8 = vld [vmem:[%s3062_s1 + $0x28] sm:$0xff]  ;;  %161 = vrot.lane.b32.xlu0 %v2691_v7, %s2638_s24  ;;  %v2557_v13 = vpack.c.bf16 %v19_v10, %v2691_v7  ;;  %v2711_v14 = vld [vmem:[%s3062_s1 + $0x38] sm:$0xff]  ;;  %v2716_v15 = vld [vmem:[%s3063_s2] sm:$0x1] }
   0x4   :  { %165 = vrot.lane.b32.xlu1 %v2696_v8, %s2638_s24  ;;  %2550 = vmatprep.subr.bf16.mxu0 %v2549_v4 }
   0x5   :  { %v650_v12 = vunpack.c.l.b16 %v646_v5 }
   0x6   :  { %8 = vsyncpa [#allocation4], 0  ;;  %2552 = vmatpush3.bf16.msra.mxu0 %v2549_v4  ;;  %v651_v16 = vunpack.c.l.b16 %v647_v9  ;;  %v2719_v17 = vsub.s32 0, %v2705_v11  ;;  %vm549_vm1 = vcmask 1041409   ;;  %v2639_v22 = vmov 0.0|0.0   ;;  %s2642_s1 = smov 96  }
   0x7   :  { %v652_v18 = vrot.slane %v650_v12, 7  ;;  %2558 = vmatprep.subr.bf16.mxu0 %v2557_v13  ;;  %163 = vrot.lane.b32.xlu0 %v19_v10, %s2638_s24  ;;  %v2640_v27 = vmov 0.0   ;;  %vm2641_vm2 = vmmov 0   ;;  %s2643_s2 = smov 64   ;;  %v2598_v37 = vpack.i.bf16 %v19_v10, %v2691_v7  ;;  %s2646_s30 = smov [#allocation3]  }
   0x8   :  { %v653_v19 = vrot.slane %v651_v16, 6  ;;  %167 = vrot.lane.b32.xlu1 %v2711_v14, %s2638_s24  ;;  %v2726_v20 = vrot.slane %v2716_v15, %v2719_v17  ;;  %v2593_v38 = vpack.i.bf16 %v2677_v1, %v2672_v0  ;;  %v2603_v39 = vpack.i.bf16 %v2711_v14, %v2696_v8  ;;  %s2196_s4 = sshll.u32 %s2646_s30, 4  ;;  %s2197_s4 = int_to_ptr.vmem [resolvable:$true] %s2196_s4 }
   0x9   :  { %2341 = vmatmul.mubr.msk.f32.vlgmr.msra.gmra.mrb[0].mxu0 %vm25_vm0, %v24_v6  ;;  %v641_v40 = vpack.c.bf16 %v2711_v14, %v2696_v8  ;;  %v2644_v41 = vmov 1966171168   ;;  %vm139_vm3 = vcmask 259072   ;;  %vm566_vm4 = vcmask 261120   ;;  %s2614_s5 = scalar_lea.vmem %s2197_s4, 256  ;;  %p2619_p1 = scmp.lt.s32.totalorder %s2197_s4, %s2197_s4 }
   0xa   :  { %v654_v21 = vsel %vm549_vm1, %v653_v19, %v652_v18  ;;  %2560 = vmatpush3.bf16.msra.mxu0 %v2557_v13  ;;  %v501_v42 = vunpack.c.l.s4 %v2644_v41  ;;  %vm761_vm5 = vcmask 254976   ;;  %vm2186_vm6 = vcmask 1040384   ;;  %p2615_p0 = scmp.ne.s32.totalorder %s2197_s4, %s2614_s5  ;;  %p2620_p2 = scmp.lt.s32.totalorder %s2614_s5, %s2614_s5 }
   0xb   :  { %2564 = vmatprep.subr.bf16.mxu0 %v2639_v22  ;;  %355 = vrot.lane.b32.xlu0 %v2726_v20, %s2638_s24  ;;  %v655_v30 = vpack.c.b16 %v654_v21, %v654_v21 }
   0xc   :  { %657 = vrot.lane.b32.xlu1 %v2549_v4, %s2638_s24  ;;  %v502_v44 = vunpack.c.0.s8 %v501_v42  ;;  %p2621_p3 = por %p2620_p2, %p2619_p1 }
   0xe   :  { %v2783_v50 = vsub.s32 %v502_v44, %v2705_v11  ;;  %p2622_p4 = pnand %p2621_p3, %p2615_p0 }
  0x75   :  { %v2734_v23 = vpop.permute.xlu0 %161 }
  0x76   :  { %v2736_v24 = vpop.permute.xlu1 %165  ;;  %2357 = vmatprep.mubr.msk.f32.mxu0 %vm25_vm0, %v2734_v23  ;;  %2347 = vmatprep.mubr.msk.f32.mxu1 %vm25_vm0, %v2734_v23 }
  0x79   :  { %v2742_v25 = vpop.permute.xlu0 %163 }
  0x7a   :  { %2358 = vmatmul.mubr.msk.f32.vlgmr.msra.gmra.mrb[2].mxu0 %vm25_vm0, %v2742_v25  ;;  %v2746_v26 = vpop.permute.xlu1 %167 }
  0x7b   :  { %2360 = vmatprep.mubr.msk.f32.mxu0 %vm25_vm0, %v2736_v24  ;;  %2566 = vmatpush3.bf16.msra.mxu0 %v2557_v13 }
  0x7c   :  { %2388 = vmatprep.subr.bf16.mxu0 %v2640_v27 }
  0x7d   :  { %v2753_v28 = vpop.permute.xlu0 %355 }
  0x7e   :  { %2361 = vmatmul.mubr.msk.f32.gmra.mrb[4].mxu0 %vm25_vm0, %v2746_v26  ;;  %v658_v29 = vpop.permute.xlu1 %657 }
  0x7f   :  { %2374 = vmatprep.mubr.msk.f32.mxu0 %vm2641_vm2, %v2640_v27 }
  0x82   :  { %2375 = vmatmul.mubr.msk.f32.vlgmr.msra.gmra.mrb[6].mxu0 %vm25_vm0, %v2753_v28 }
  0x83   :  { %2389 = vmatpush3.bf16.msra.mxu0 %v658_v29  ;;  %2390 = vmatprep.mubr.msk.bf16.mxu0 %vm2641_vm2, %v2640_v27 }
  0x84   :  { %2394 = vmatprep.subr.bf16.mxu0 %v2640_v27 }
  0x86   :  { %2391 = vmatmul.mubr.msk.bf16.vlgmr.msra.gmra.mrb[8].mxu0 %vm25_vm0, %v655_v30 }
  0x87   :  { %2398 = vmatprep.mubr.msk.bf16.mxu0 %vm2641_vm2, %v2640_v27 }
  0xdc   :  { %v2342_v31 = vpop.f32.mrb[0].mxu0 }
  0xdd   :  { %v110_v32 = vrot.slane %v2342_v31, 1  ;;  %v98_v33 = vpop.f32.mrb[1].mxu0  ;;  %v120_v35 = vrot.slane %v2342_v31, 2 }
  0xde   :  { %v109_v34 = vrot.slane %v98_v33, 1  ;;  %v119_v36 = vrot.slane %v98_v33, 2 }
  0xdf   :  { %113 = vrot.lane.b32.xlu1 %v110_v32, %s2642_s1 }
  0xe0   :  { %111 = vrot.lane.b32.xlu0 %v109_v34, %s2642_s1 }
  0xe3   :  { %123 = vrot.lane.b32.xlu1 %v120_v35, %s2643_s2 }
  0xe4   :  { %121 = vrot.lane.b32.xlu0 %v119_v36, %s2643_s2 }
  0xe7   :  { %2599 = vrot.lane.b32.xlu1 %v2598_v37, %s2643_s2 }
  0xe8   :  { %2594 = vrot.lane.b32.xlu0 %v2593_v38, %s2638_s24 }
  0xeb   :  { %710 = vrot.lane.b32.xlu1 %v2557_v13, %s2642_s1 }
  0xec   :  { %2604 = vrot.lane.b32.xlu0 %v2603_v39, %s2643_s2 }
  0xef   :  { %712 = vrot.lane.b32.xlu1 %v641_v40, %s2642_s1 }
  0xf0   :  { %660 = vrot.lane.b32.xlu0 %v2726_v20, %s2642_s1 }
  0xf4   :  { %563 = vrot.lane.b32.xlu0 %v2726_v20, %s2643_s2 }
 0x14d   :  { %v2359_v43 = vpop.f32.mrb[2].mxu0 }
 0x14e   :  { %v336_v45 = vpop.f32.mrb[3].mxu0 }
 0x14f   :  { %v2780_v46 = vpack.c.bf16 %v2359_v43, %v336_v45 }
 0x151   :  { %v114_v47 = vpop.permute.xlu1 %113  ;;  %v2362_v49 = vpop.f32.mrb[4].mxu0 }
 0x152   :  { %v112_v48 = vpop.permute.xlu0 %111  ;;  %v346_v51 = vpop.f32.mrb[5].mxu0  ;;  %v118_v52 = vadd.f32 %v2342_v31, %v114_v47 }
 0x153   :  { %v2785_v53 = vpack.c.bf16 %v2362_v49, %v346_v51  ;;  %v117_v54 = vadd.f32 %v112_v48, %v98_v33 }
 0x155   :  { %v124_v55 = vpop.permute.xlu1 %123  ;;  %v495_v58 = vpop.f32.mrb[6].mxu0 }
 0x156   :  { %v128_v56 = vadd.f32 %v124_v55, %v118_v52  ;;  %v122_v57 = vpop.permute.xlu0 %121  ;;  %v506_v60 = vrot.slane %v495_v58, %v2783_v50  ;;  %v2376_v61 = vpop.f32.mrb[7].mxu0 }
 0x157   :  { %v127_v59 = vadd.f32 %v122_v57, %v117_v54 }
 0x158   :  { %v136_v62 = vadd.f32 %v2726_v20, %v128_v56  ;;  %v513_v1 = vrot.slane %v506_v60, %v2783_v50 }
 0x159   :  { %v135_v63 = vadd.f32 %v2726_v20, %v127_v59  ;;  %v2600_v0 = vpop.permute.xlu1 %2599  ;;  %v700_v4 = vpop.f32.mrb[8].mxu0 }
 0x15a   :  { %v138_v2 = vmax.f32 %v136_v62, 0.0  ;;  %v2595_v3 = vpop.permute.xlu0 %2594  ;;  %v2392_v8 = vpop.f32.mrb[9].mxu0  ;;  %514 = vrot.lane.b32.xlu1 %v513_v1, %s2638_s24  ;;  %v2602_v38 = vunpack.i.h.bf16 %v2600_v0  ;;  %v2601_v39 = vunpack.i.l.bf16 %v2600_v0 }
 0x15b   :  { %v137_v5 = vmax.f32 %v135_v63, 0.0  ;;  %v2597_v6 = vunpack.i.h.bf16 %v2595_v3  ;;  %v2596_v7 = vunpack.i.l.bf16 %v2595_v3  ;;  %v703_v10 = vpop.f32.mrb[10].mxu0 }
 0x15c   :  { %v147_v9 = vsel %vm139_vm3, %v138_v2, 0.0  ;;  %v2393_v18 = vpop.f32.mrb[11].mxu0  ;;  %v2568_v47 = vpack.c.bf16 %v2602_v38, %v2601_v39 }
 0x15d   :  { %v148_v12 = vrot.slane %v147_v9, 4  ;;  %v140_v13 = vsel %vm139_vm3, %v137_v5, 0.0  ;;  %v2553_v14 = vpack.c.bf16 %v2597_v6, %v2596_v7  ;;  %v2792_v16 = vpop.permute.xlu1 %710 }
 0x15e   :  { %v141_v19 = vrot.slane %v140_v13, 4  ;;  %v2605_v21 = vpop.permute.xlu0 %2604  ;;  %2395 = vmatpush3.bf16.msra.mxu0 %v2792_v16 }
 0x15f   :  { %v149_v29 = vadd.f32 %v148_v12, %v147_v9  ;;  %2554 = vmatprep.subr.bf16.mxu1 %v2553_v14  ;;  %2396 = vmatprep.subr.bf16.mxu0 %v2640_v27  ;;  %v2607_v48 = vunpack.i.h.bf16 %v2605_v21  ;;  %v2606_v49 = vunpack.i.l.bf16 %v2605_v21 }
 0x160   :  { %v142_v30 = vadd.f32 %v141_v19, %v140_v13  ;;  %2556 = vmatpush3.bf16.msra.mxu1 %v2553_v14 }
 0x161   :  { %v150_v31 = vrot.slane %v149_v29, 2  ;;  %2561 = vmatprep.subr.bf16.mxu1 %v2639_v22  ;;  %v2797_v32 = vpop.permute.xlu1 %712  ;;  %v2571_v54 = vpack.c.bf16 %v2607_v48, %v2606_v49 }
 0x162   :  { %v143_v33 = vrot.slane %v142_v30, 2  ;;  %v661_v34 = vpop.permute.xlu0 %660  ;;  %2397 = vmatpush3.bf16.msra.mxu0 %v2797_v32 }
 0x163   :  { %v151_v35 = vadd.f32 %v150_v31, %v149_v29  ;;  %2348 = vmatmul.mubr.msk.f32.vlgmr.msra.gmra.mrb[0].mxu1 %vm25_vm0, %v2742_v25  ;;  %v701_v36 = vadd.f32 %v700_v4, %v661_v34  ;;  %2410 = vmatprep.subr.bf16.mxu0 %v2640_v27 }
 0x164   :  { %v144_v37 = vadd.f32 %v143_v33, %v142_v30  ;;  %2350 = vmatprep.mubr.msk.f32.mxu1 %vm25_vm0, %v2736_v24  ;;  %2563 = vmatpush3.bf16.msra.mxu1 %v2553_v14 }
 0x165   :  { %v152_v40 = vrot.slane %v151_v35, 1  ;;  %v706_v41 = vmax.f32 %v701_v36, 0.0  ;;  %2567 = vmatprep.subr.bf16.mxu1 %v2639_v22 }
 0x166   :  { %v145_v42 = vrot.slane %v144_v37, 1  ;;  %v564_v6 = vpop.permute.xlu0 %563 }
 0x167   :  { %v153_v43 = vadd.f32 %v152_v40, %v151_v35  ;;  %v707_v44 = vpack.c.bf16 %v706_v41, %v706_v41  ;;  %2351 = vmatmul.mubr.msk.f32.gmra.mrb[2].mxu1 %vm25_vm0, %v2746_v26 }
 0x168   :  { %v146_v45 = vadd.f32 %v145_v42, %v144_v37  ;;  %2367 = vmatprep.mubr.msk.f32.mxu1 %vm2641_vm2, %v2640_v27 }
 0x169   :  { %2399 = vmatmul.mubr.msk.bf16.vlgmr.msra.gmra.mrb[12].mxu0 %vm566_vm4, %v707_v44  ;;  %v156_v51 = vmul.f32 0.16666667, %v153_v43 }
 0x16a   :  { %2411 = vmatpush3.bf16.msra.mxu0 %v2792_v16  ;;  %v155_v52 = vmul.f32 0.16666667, %v146_v45  ;;  %2414 = vmatprep.mubr.msk.bf16.mxu0 %vm2641_vm2, %v2640_v27 }
 0x16b   :  { %2368 = vmatmul.mubr.msk.f32.vlgmr.msra.gmra.mrb[4].mxu1 %vm25_vm0, %v2753_v28  ;;  %2412 = vmatprep.subr.bf16.mxu0 %v2640_v27 }
 0x16c   :  { %2569 = vmatpush3.bf16.msra.mxu1 %v2568_v47  ;;  %2385 = vmatprep.mubr.msk.f32.mxu1 %vm2641_vm2, %v2640_v27  ;;  %v550_v55 = vsel %vm549_vm1, %v156_v51, %v155_v52 }
 0x16d   :  { %2570 = vmatprep.subr.bf16.mxu1 %v2639_v22 }
 0x16e   :  { %2413 = vmatpush3.bf16.msra.mxu0 %v2797_v32 }
 0x16f   :  { %2426 = vmatprep.subr.bf16.mxu0 %v2640_v27 }
 0x170   :  { %2572 = vmatpush3.bf16.msra.mxu1 %v2571_v54 }
 0x171   :  { %2402 = vmatprep.subr.bf16.mxu1 %v2640_v27 }
 0x173   :  { %2386 = vmatmul.mubr.msk.f32.vlgmr.msra.gmra.mrb[6].mxu1 %vm566_vm4, %v550_v55 }
 0x174   :  { %2403 = vmatpush3.bf16.msra.mxu1 %v2780_v46  ;;  %2406 = vmatprep.mubr.msk.bf16.mxu1 %vm2641_vm2, %v2640_v27 }
 0x175   :  { %2404 = vmatprep.subr.bf16.mxu1 %v2640_v27 }
 0x178   :  { %2405 = vmatpush3.bf16.msra.mxu1 %v2785_v53 }
 0x179   :  { %2418 = vmatprep.subr.bf16.mxu1 %v2640_v27 }
 0x1cc   :  { %v515_v22 = vpop.permute.xlu1 %514 }
 0x1cd   :  { %v517_v28 = vadd.f32 %v515_v22, %v2716_v15 }
 0x1cf   :  { %v522_v56 = vrot.slane %v517_v28, %v2719_v17 }
 0x1d1   :  { %764 = vrot.lane.b32.xlu0 %v522_v56, %s2642_s1 }
 0x236   :  { %v2349_v57 = vpop.f32.mrb[0].mxu1 }
 0x237   :  { %v251_v58 = vpop.f32.mrb[1].mxu1 }
 0x238   :  { %v2834_v59 = vpack.c.bf16 %v2349_v57, %v251_v58 }
 0x23a   :  { %v2352_v60 = vpop.f32.mrb[2].mxu1 }
 0x23b   :  { %v261_v61 = vpop.f32.mrb[3].mxu1 }
 0x23c   :  { %v2836_v62 = vpack.c.bf16 %v2352_v60, %v261_v61  ;;  %v753_v63 = vpop.f32.mrb[12].mxu0 }
 0x23d   :  { %v2400_v0 = vpop.f32.mrb[13].mxu0 }
 0x23e   :  { %v425_v1 = vpop.f32.mrb[4].mxu1  ;;  %v756_v2 = vpop.f32.mrb[14].mxu0 }
 0x23f   :  { %v530_v3 = vrot.slane %v425_v1, %v2783_v50  ;;  %v2369_v4 = vpop.f32.mrb[5].mxu1  ;;  %v2401_v15 = vpop.f32.mrb[15].mxu0 }
 0x241   :  { %v537_v5 = vrot.slane %v530_v3, %v2783_v50 }
 0x243   :  { %538 = vrot.lane.b32.xlu1 %v537_v5, %s2638_s24  ;;  %v765_v21 = vpop.permute.xlu0 %764 }
 0x246   :  { %v635_v7 = vpop.f32.mrb[6].mxu1 }
 0x247   :  { %v2841_v8 = vadd.f32 %v635_v7, %v564_v6  ;;  %v2387_v9 = vpop.f32.mrb[7].mxu1 }
 0x249   :  { %v754_v10 = vadd.f32 %v753_v63, %v2841_v8 }
 0x24b   :  { %v759_v12 = vmax.f32 %v754_v10, 0.0 }
 0x24d   :  { %v763_v13 = vpack.c.bf16 %v759_v12, %v759_v12  ;;  %762 = vst.msk [vmem:[#allocation2 + $0x2] sm:$0x3] %vm761_vm5, %v759_v12 }
 0x24f   :  { %2407 = vmatmul.mubr.msk.bf16.vlgmr.msra.gmra.mrb[8].mxu1 %vm566_vm4, %v763_v13 }
 0x250   :  { %2419 = vmatpush3.bf16.msra.mxu1 %v2780_v46  ;;  %2422 = vmatprep.mubr.msk.bf16.mxu1 %vm2641_vm2, %v2640_v27 }
 0x251   :  { %2420 = vmatprep.subr.bf16.mxu1 %v2640_v27 }
 0x254   :  { %2421 = vmatpush3.bf16.msra.mxu1 %v2785_v53 }
 0x255   :  { %2434 = vmatprep.subr.bf16.mxu1 %v2640_v27 }
 0x2b5   :  { %v539_v14 = vpop.permute.xlu1 %538 }
 0x2b6   :  { %v541_v18 = vadd.f32 %v539_v14, %v517_v28 }
 0x2b8   :  { %v546_v19 = vrot.slane %v541_v18, %v2719_v17 }
 0x2ba   :  { %942 = vrot.lane.b32.xlu0 %v546_v19, %s2642_s1 }
 0x322   :  { %v804_v29 = vpop.f32.mrb[8].mxu1 }
 0x323   :  { %v805_v30 = vadd.f32 %v804_v29, %v765_v21  ;;  %v2408_v31 = vpop.f32.mrb[9].mxu1 }
 0x324   :  { %v807_v33 = vpop.f32.mrb[10].mxu1 }
 0x325   :  { %v810_v34 = vmax.f32 %v805_v30, 0.0  ;;  %v2409_v35 = vpop.f32.mrb[11].mxu1 }
 0x327   :  { %v811_v36 = vpack.c.bf16 %v810_v34, %v810_v34 }
 0x329   :  { %2415 = vmatmul.mubr.msk.bf16.vlgmr.msra.gmra.mrb[16].mxu0 %vm566_vm4, %v811_v36 }
 0x32a   :  { %2427 = vmatpush3.bf16.msra.mxu0 %v2834_v59  ;;  %2430 = vmatprep.mubr.msk.bf16.mxu0 %vm2641_vm2, %v2640_v27 }
 0x32b   :  { %2428 = vmatprep.subr.bf16.mxu0 %v2640_v27 }
 0x32c   :  { %v2877_v52 = vpop.permute.xlu0 %942 }
 0x32e   :  { %2429 = vmatpush3.bf16.msra.mxu0 %v2836_v62 }
 0x32f   :  { %2442 = vmatprep.subr.bf16.mxu0 %v2640_v27 }
 0x331   :  { %2431 = vmatmul.mubr.msk.bf16.vlgmr.msra.gmra.mrb[20].mxu0 %vm566_vm4, %v763_v13 }
 0x332   :  { %2443 = vmatpush3.bf16.msra.mxu0 %v2780_v46  ;;  %2446 = vmatprep.mubr.msk.bf16.mxu0 %vm2641_vm2, %v2640_v27 }
 0x333   :  { %2444 = vmatprep.subr.bf16.mxu0 %v2640_v27 }
 0x336   :  { %2445 = vmatpush3.bf16.msra.mxu0 %v2785_v53 }
 0x337   :  { %2458 = vmatprep.subr.bf16.mxu0 %v2640_v27 }
 0x3fc   :  { %v849_v17 = vpop.f32.mrb[16].mxu0 }
 0x3fd   :  { %v850_v37 = vadd.f32 %v849_v17, %v2841_v8  ;;  %v2416_v38 = vpop.f32.mrb[17].mxu0 }
 0x3fe   :  { %v852_v39 = vpop.f32.mrb[18].mxu0 }
 0x3ff   :  { %v855_v40 = vmax.f32 %v850_v37, 0.0  ;;  %v2417_v41 = vpop.f32.mrb[19].mxu0 }
 0x401   :  { %857 = vst.msk [vmem:[#allocation2 + $0x4] sm:$0x3] %vm761_vm5, %v855_v40  ;;  %v858_v42 = vpack.c.bf16 %v855_v40, %v855_v40 }
 0x403   :  { %2423 = vmatmul.mubr.msk.bf16.vlgmr.msra.gmra.mrb[12].mxu1 %vm566_vm4, %v858_v42 }
 0x404   :  { %2435 = vmatpush3.bf16.msra.mxu1 %v2792_v16  ;;  %v936_v43 = vpop.f32.mrb[20].mxu0  ;;  %2438 = vmatprep.mubr.msk.bf16.mxu1 %vm2641_vm2, %v2640_v27 }
 0x405   :  { %v2432_v44 = vpop.f32.mrb[21].mxu0  ;;  %2436 = vmatprep.subr.bf16.mxu1 %v2640_v27 }
 0x406   :  { %v939_v45 = vpop.f32.mrb[22].mxu0 }
 0x407   :  { %v2433_v47 = vpop.f32.mrb[23].mxu0 }
 0x408   :  { %2437 = vmatpush3.bf16.msra.mxu1 %v2797_v32 }
 0x409   :  { %2450 = vmatprep.subr.bf16.mxu1 %v2640_v27 }
 0x4d6   :  { %v896_v48 = vpop.f32.mrb[12].mxu1 }
 0x4d7   :  { %v937_v49 = vadd.f32 %v936_v43, %v896_v48  ;;  %v2424_v51 = vpop.f32.mrb[13].mxu1 }
 0x4d8   :  { %v899_v54 = vpop.f32.mrb[14].mxu1 }
 0x4d9   :  { %v945_v55 = vadd.f32 %v2877_v52, %v937_v49  ;;  %v2425_v22 = vpop.f32.mrb[15].mxu1 }
 0x4db   :  { %v946_v28 = vmax.f32 %v945_v55, 0.0 }
 0x4dd   :  { %v947_v56 = vpack.c.bf16 %v946_v28, %v946_v28 }
 0x4df   :  { %2439 = vmatmul.mubr.msk.bf16.vlgmr.msra.gmra.mrb[16].mxu1 %vm566_vm4, %v947_v56 }
 0x4e0   :  { %2451 = vmatpush3.bf16.msra.mxu1 %v2834_v59  ;;  %2454 = vmatprep.mubr.msk.bf16.mxu1 %vm2641_vm2, %v2640_v27 }
 0x4e1   :  { %2452 = vmatprep.subr.bf16.mxu1 %v2640_v27 }
 0x4e4   :  { %2453 = vmatpush3.bf16.msra.mxu1 %v2836_v62 }
 0x4e5   :  { %2466 = vmatprep.subr.bf16.mxu1 %v2640_v27 }
 0x4e7   :  { %2455 = vmatmul.mubr.msk.bf16.vlgmr.msra.gmra.mrb[20].mxu1 %vm566_vm4, %v858_v42 }
 0x4e8   :  { %2467 = vmatpush3.bf16.msra.mxu1 %v2780_v46  ;;  %2470 = vmatprep.mubr.msk.bf16.mxu1 %vm2641_vm2, %v2640_v27 }
 0x4e9   :  { %2468 = vmatprep.subr.bf16.mxu1 %v2640_v27 }
 0x4ec   :  { %2469 = vmatpush3.bf16.msra.mxu1 %v2785_v53 }
 0x4ed   :  { %2482 = vmatprep.subr.bf16.mxu1 %v2640_v27 }
 0x5b2   :  { %v985_v57 = vpop.f32.mrb[16].mxu1 }
 0x5b3   :  { %v986_v58 = vadd.f32 %v985_v57, %v2841_v8  ;;  %v2440_v60 = vpop.f32.mrb[17].mxu1 }
 0x5b4   :  { %v988_v61 = vpop.f32.mrb[18].mxu1 }
 0x5b5   :  { %v991_v63 = vmax.f32 %v986_v58, 0.0  ;;  %v2441_v0 = vpop.f32.mrb[19].mxu1 }
 0x5b7   :  { %993 = vst.msk [vmem:[#allocation2 + $0x6] sm:$0x3] %vm761_vm5, %v991_v63  ;;  %v994_v1 = vpack.c.bf16 %v991_v63, %v991_v63 }
 0x5b9   :  { %2447 = vmatmul.mubr.msk.bf16.vlgmr.msra.gmra.mrb[24].mxu0 %vm566_vm4, %v994_v1 }
 0x5ba   :  { %2459 = vmatpush3.bf16.msra.mxu0 %v2792_v16  ;;  %v1072_v2 = vpop.f32.mrb[20].mxu1  ;;  %2462 = vmatprep.mubr.msk.bf16.mxu0 %vm2641_vm2, %v2640_v27 }
 0x5bb   :  { %v2456_v3 = vpop.f32.mrb[21].mxu1  ;;  %2460 = vmatprep.subr.bf16.mxu0 %v2640_v27 }
 0x5bc   :  { %v1075_v4 = vpop.f32.mrb[22].mxu1  ;;  %v2577_v3 = vpack.c.bf16 %v2746_v26, %v2736_v24 }
 0x5bd   :  { %v2457_v15 = vpop.f32.mrb[23].mxu1 }
 0x5be   :  { %2461 = vmatpush3.bf16.msra.mxu0 %v2797_v32 }
 0x5bf   :  { %2474 = vmatprep.subr.bf16.mxu0 %v2640_v27 }
 0x68c   :  { %v1032_v5 = vpop.f32.mrb[24].mxu0 }
 0x68d   :  { %v1073_v6 = vadd.f32 %v1072_v2, %v1032_v5  ;;  %v2448_v7 = vpop.f32.mrb[25].mxu0  ;;  %v2573_v2 = vpack.c.bf16 %v2742_v25, %v2734_v23 }
 0x68e   :  { %v1035_v9 = vpop.f32.mrb[26].mxu0 }
 0x68f   :  { %v1078_v10 = vadd.f32 %v1073_v6, %v2877_v52  ;;  %v2449_v12 = vpop.f32.mrb[27].mxu0 }
 0x691   :  { %v1079_v13 = vmax.f32 %v1078_v10, 0.0 }
 0x693   :  { %v1080_v14 = vpack.c.bf16 %v1079_v13, %v1079_v13 }
 0x695   :  { %2463 = vmatmul.mubr.msk.bf16.vlgmr.msra.gmra.mrb[28].mxu0 %vm566_vm4, %v1080_v14 }
 0x696   :  { %2475 = vmatpush3.bf16.msra.mxu0 %v2834_v59  ;;  %2478 = vmatprep.mubr.msk.bf16.mxu0 %vm2641_vm2, %v2640_v27 }
 0x697   :  { %2476 = vmatprep.subr.bf16.mxu0 %v2640_v27 }
 0x69a   :  { %2477 = vmatpush3.bf16.msra.mxu0 %v2836_v62 }
 0x69b   :  { %2490 = vmatprep.subr.bf16.mxu0 %v2640_v27 }
 0x69d   :  { %2479 = vmatmul.mubr.msk.bf16.vlgmr.msra.gmra.mrb[32].mxu0 %vm566_vm4, %v994_v1 }
 0x69e   :  { %2491 = vmatpush3.bf16.msra.mxu0 %v2780_v46  ;;  %2494 = vmatprep.mubr.msk.bf16.mxu0 %vm2641_vm2, %v2640_v27 }
 0x69f   :  { %2492 = vmatprep.subr.bf16.mxu0 %v2640_v27 }
 0x6a2   :  { %2493 = vmatpush3.bf16.msra.mxu0 %v2785_v53 }
 0x6a3   :  { %2506 = vmatprep.subr.bf16.mxu0 %v2640_v27 }
 0x768   :  { %v1118_v18 = vpop.f32.mrb[28].mxu0 }
 0x769   :  { %v1119_v19 = vadd.f32 %v1118_v18, %v2841_v8  ;;  %v2464_v21 = vpop.f32.mrb[29].mxu0 }
 0x76a   :  { %v1121_v29 = vpop.f32.mrb[30].mxu0  ;;  %v1673_v21 = vcombine.high %v2726_v20, %v2726_v20 }
 0x76b   :  { %v1124_v30 = vmax.f32 %v1119_v19, 0.0  ;;  %v2465_v31 = vpop.f32.mrb[31].mxu0 }
 0x76c   :  { %v1687_v29 = vrot.slane %v1673_v21, %v2783_v50 }
 0x76d   :  { %1126 = vst.msk [vmem:[#allocation2 + $0x8] sm:$0x3] %vm761_vm5, %v1124_v30  ;;  %v1127_v33 = vpack.c.bf16 %v1124_v30, %v1124_v30 }
 0x76e   :  { %v1689_v31 = vcombine.high %v1687_v29, %v1687_v29 }
 0x76f   :  { %2471 = vmatmul.mubr.msk.bf16.vlgmr.msra.gmra.mrb[24].mxu1 %vm566_vm4, %v1127_v33 }
 0x770   :  { %2483 = vmatpush3.bf16.msra.mxu1 %v2792_v16  ;;  %v1205_v34 = vpop.f32.mrb[32].mxu0  ;;  %2486 = vmatprep.mubr.msk.bf16.mxu1 %vm2641_vm2, %v2640_v27 }
 0x771   :  { %v2480_v35 = vpop.f32.mrb[33].mxu0  ;;  %2484 = vmatprep.subr.bf16.mxu1 %v2640_v27 }
 0x772   :  { %v1208_v36 = vpop.f32.mrb[34].mxu0  ;;  %v1717_v35 = vrot.slane %v1689_v31, %v2783_v50 }
 0x773   :  { %v2481_v17 = vpop.f32.mrb[35].mxu0 }
 0x774   :  { %2485 = vmatpush3.bf16.msra.mxu1 %v2797_v32 }
 0x775   :  { %2498 = vmatprep.subr.bf16.mxu1 %v2640_v27 }
 0x842   :  { %v1165_v37 = vpop.f32.mrb[24].mxu1 }
 0x843   :  { %v1206_v38 = vadd.f32 %v1205_v34, %v1165_v37  ;;  %v2472_v39 = vpop.f32.mrb[25].mxu1 }
 0x844   :  { %v1168_v40 = vpop.f32.mrb[26].mxu1 }
 0x845   :  { %v1211_v41 = vadd.f32 %v1206_v38, %v2877_v52  ;;  %v2473_v42 = vpop.f32.mrb[27].mxu1 }
 0x847   :  { %v1212_v43 = vmax.f32 %v1211_v41, 0.0 }
 0x849   :  { %v1213_v44 = vpack.c.bf16 %v1212_v43, %v1212_v43 }
 0x84b   :  { %2487 = vmatmul.mubr.msk.bf16.vlgmr.msra.gmra.mrb[28].mxu1 %vm566_vm4, %v1213_v44 }
 0x84c   :  { %2499 = vmatpush3.bf16.msra.mxu1 %v2834_v59  ;;  %2502 = vmatprep.mubr.msk.bf16.mxu1 %vm2641_vm2, %v2640_v27 }
 0x84d   :  { %2500 = vmatprep.subr.bf16.mxu1 %v2640_v27 }
 0x850   :  { %2501 = vmatpush3.bf16.msra.mxu1 %v2836_v62 }
 0x851   :  { %2514 = vmatprep.subr.bf16.mxu1 %v2640_v27 }
 0x853   :  { %2503 = vmatmul.mubr.msk.bf16.vlgmr.msra.gmra.mrb[32].mxu1 %vm566_vm4, %v1127_v33  ;;  %v1703_v33 = vrot.slane %v1687_v29, %v2783_v50 }
 0x854   :  { %2515 = vmatpush3.bf16.msra.mxu1 %v2780_v46  ;;  %2518 = vmatprep.mubr.msk.bf16.mxu1 %vm2641_vm2, %v2640_v27 }
 0x855   :  { %2516 = vmatprep.subr.bf16.mxu1 %v2640_v27  ;;  %v1719_v36 = vcombine.high %v1703_v33, %v1703_v33  ;;  %v1816_v42 = vcombine.low %v1703_v33, %v1717_v35 }
 0x858   :  { %2517 = vmatpush3.bf16.msra.mxu1 %v2785_v53 }
 0x859   :  { %2530 = vmatprep.subr.bf16.mxu1 %v2640_v27 }
 0x91e   :  { %v1251_v45 = vpop.f32.mrb[28].mxu1 }
 0x91f   :  { %v1252_v47 = vadd.f32 %v1251_v45, %v2841_v8  ;;  %v2488_v48 = vpop.f32.mrb[29].mxu1 }
 0x920   :  { %v1254_v49 = vpop.f32.mrb[30].mxu1 }
 0x921   :  { %v1257_v51 = vmax.f32 %v1252_v47, 0.0  ;;  %v2489_v54 = vpop.f32.mrb[31].mxu1  ;;  %v1838_v49 = vrot.slane %v1816_v42, %v2783_v50 }
 0x923   :  { %1259 = vst.msk [vmem:[#allocation2 + $0xa] sm:$0x3] %vm761_vm5, %v1257_v51  ;;  %v1260_v55 = vpack.c.bf16 %v1257_v51, %v1257_v51 }
 0x925   :  { %2495 = vmatmul.mubr.msk.bf16.vlgmr.msra.gmra.mrb[36].mxu0 %vm566_vm4, %v1260_v55 }
 0x926   :  { %2507 = vmatpush3.bf16.msra.mxu0 %v2792_v16  ;;  %v1338_v46 = vpop.f32.mrb[32].mxu1  ;;  %2510 = vmatprep.mubr.msk.bf16.mxu0 %vm2641_vm2, %v2640_v27 }
 0x927   :  { %v2504_v53 = vpop.f32.mrb[33].mxu1  ;;  %2508 = vmatprep.subr.bf16.mxu0 %v2640_v27 }
 0x928   :  { %v1341_v22 = vpop.f32.mrb[34].mxu1 }
 0x929   :  { %v2505_v28 = vpop.f32.mrb[35].mxu1 }
 0x92a   :  { %2509 = vmatpush3.bf16.msra.mxu0 %v2797_v32 }
 0x92b   :  { %2522 = vmatprep.subr.bf16.mxu0 %v2640_v27 }
 0x9f8   :  { %v1298_v56 = vpop.f32.mrb[36].mxu0 }
 0x9f9   :  { %v1339_v57 = vadd.f32 %v1338_v46, %v1298_v56  ;;  %v2496_v58 = vpop.f32.mrb[37].mxu0 }
 0x9fa   :  { %v1301_v60 = vpop.f32.mrb[38].mxu0 }
 0x9fb   :  { %v1344_v61 = vadd.f32 %v1339_v57, %v2877_v52  ;;  %v2497_v63 = vpop.f32.mrb[39].mxu0 }
 0x9fd   :  { %v1345_v0 = vmax.f32 %v1344_v61, 0.0 }
 0x9ff   :  { %v1346_v1 = vpack.c.bf16 %v1345_v0, %v1345_v0 }
 0xa01   :  { %2511 = vmatmul.mubr.msk.bf16.vlgmr.msra.gmra.mrb[40].mxu0 %vm566_vm4, %v1346_v1 }
 0xa02   :  { %2523 = vmatpush3.bf16.msra.mxu0 %v2834_v59  ;;  %2526 = vmatprep.mubr.msk.bf16.mxu0 %vm2641_vm2, %v2640_v27 }
 0xa03   :  { %2524 = vmatprep.subr.bf16.mxu0 %v2640_v27 }
 0xa06   :  { %2525 = vmatpush3.bf16.msra.mxu0 %v2836_v62 }
 0xa07   :  { %2574 = vmatprep.subr.bf16.mxu0 %v2573_v2 }
 0xa09   :  { %2527 = vmatmul.mubr.msk.bf16.vlgmr.msra.gmra.mrb[44].mxu0 %vm566_vm4, %v1260_v55 }
 0xa0a   :  { %2576 = vmatpush3.bf16.msra.mxu0 %v2573_v2 }
 0xa0b   :  { %2578 = vmatprep.subr.bf16.mxu0 %v2577_v3 }
 0xa0e   :  { %2580 = vmatpush3.bf16.msra.mxu0 %v2577_v3  ;;  %v2611_v3 = vld.sshfl [vmem:[#allocation2 + $0x4] sm:$0xf pattern:$0x76325410] }
 0xad4   :  { %v1384_v59 = vpop.f32.mrb[40].mxu0 }
 0xad5   :  { %v1385_v4 = vadd.f32 %v1384_v59, %v2841_v8  ;;  %v2512_v15 = vpop.f32.mrb[41].mxu0  ;;  %v2645_v59 = vmov 1934713408  }
 0xad6   :  { %v1387_v5 = vpop.f32.mrb[42].mxu0  ;;  %v2612_v15 = vld.sshfl [vmem:[#allocation2 + $0x2] sm:$0xf pattern:$0x76325410] }
 0xad7   :  { %v1390_v6 = vmax.f32 %v1385_v4, 0.0  ;;  %v2513_v7 = vpop.f32.mrb[43].mxu0  ;;  %v1559_v4 = vunpack.c.l.s4 %v2645_v59 }
 0xad8   :  { %v1557_v7 = vcombine.low %v2612_v15, %v2611_v3 }
 0xad9   :  { %1392 = vst.msk [vmem:[#allocation2 + $0xc] sm:$0x3] %vm761_vm5, %v1390_v6  ;;  %v1393_v23 = vpack.c.bf16 %v1390_v6, %v1390_v6  ;;  %v1560_v5 = vunpack.c.0.s8 %v1559_v4 }
 0xadb   :  { %2519 = vmatmul.mubr.msk.bf16.vlgmr.msra.gmra.mrb[36].mxu1 %vm566_vm4, %v1393_v23  ;;  %v1563_v23 = vsub.s32 %v1560_v5, %v2705_v11 }
 0xadc   :  { %2531 = vmatpush3.bf16.msra.mxu1 %v2792_v16  ;;  %v1471_v24 = vpop.f32.mrb[44].mxu0  ;;  %2534 = vmatprep.mubr.msk.bf16.mxu1 %vm2641_vm2, %v2640_v27 }
 0xadd   :  { %v2528_v25 = vpop.f32.mrb[45].mxu0  ;;  %2532 = vmatprep.subr.bf16.mxu1 %v2640_v27  ;;  %v1680_v27 = vrot.slane %v2726_v20, %v2783_v50  ;;  %v1865_v20 = vcombine.low %v1717_v35, %v1719_v36 }
 0xade   :  { %v1474_v26 = vpop.f32.mrb[46].mxu0 }
 0xadf   :  { %v2529_v62 = vpop.f32.mrb[47].mxu0  ;;  %v1696_v30 = vrot.slane %v1680_v27, %v2783_v50  ;;  %v1886_v48 = vrot.slane %v1865_v20, %v2783_v50  ;;  %v1564_v26 = vrot.slane %v1557_v7, %v1563_v23 }
 0xae0   :  { %2533 = vmatpush3.bf16.msra.mxu1 %v2797_v32  ;;  %v1688_v32 = vcombine.high %v1680_v27, %v1680_v27 }
 0xae1   :  { %v1718_v34 = vcombine.high %v1696_v30, %v1696_v30  ;;  %v1817_v43 = vcombine.low %v1719_v36, %v1696_v30  ;;  %v1901_v46 = vrot.slane %v1886_v48, %v2783_v50 }
 0xae3   :  { %v1845_v51 = vrot.slane %v1817_v43, %v2783_v50 }
 0xae5   :  { %v1847_v53 = vcombine.low %v1838_v49, %v1845_v51 }
 0xae7   :  { %v1861_v56 = vrot.slane %v1847_v53, %v2783_v50 }
 0xbae   :  { %v1431_v9 = vpop.f32.mrb[36].mxu1 }
 0xbaf   :  { %v1472_v10 = vadd.f32 %v1471_v24, %v1431_v9  ;;  %v2520_v12 = vpop.f32.mrb[37].mxu1  ;;  %v1556_v24 = vld [vmem:[#allocation2 + $0xc] sm:$0x3] }
 0xbb0   :  { %v1434_v13 = vpop.f32.mrb[38].mxu1 }
 0xbb1   :  { %v1477_v14 = vadd.f32 %v1472_v10, %v2877_v52  ;;  %v2521_v18 = vpop.f32.mrb[39].mxu1  ;;  %v1710_v52 = vrot.slane %v1688_v32, %v2783_v50 }
 0xbb3   :  { %v1478_v19 = vmax.f32 %v1477_v14, 0.0  ;;  %v1720_v17 = vcombine.high %v1710_v52, %v1710_v52  ;;  %v1863_v37 = vcombine.low %v1710_v52, %v1718_v34  ;;  %v1814_v38 = vcombine.low %v1696_v30, %v1710_v52 }
 0xbb4   :  { %v2242_v39 = vcombine.high %v1696_v30, %v1710_v52 }
 0xbb5   :  { %v1479_v16 = vpack.c.bf16 %v1478_v19, %v1478_v19  ;;  %v1864_v40 = vcombine.low %v1720_v17, %v1703_v33  ;;  %v1872_v41 = vrot.slane %v1863_v37, %v2783_v50  ;;  %v1824_v44 = vrot.slane %v1814_v38, %v2783_v50 }
 0xbb6   :  { %v1831_v45 = vrot.slane %v2242_v39, %v2783_v50 }
 0xbb7   :  { %2535 = vmatmul.mubr.msk.bf16.vlgmr.msra.gmra.mrb[40].mxu1 %vm566_vm4, %v1479_v16  ;;  %v1879_v47 = vrot.slane %v1864_v40, %v2783_v50 }
 0xbb8   :  { %v1846_v54 = vcombine.low %v1824_v44, %v1831_v45 }
 0xbb9   :  { %v1887_v55 = vcombine.low %v1872_v41, %v1879_v47 }
 0xbba   :  { %v1854_v22 = vrot.slane %v1846_v54, %v2783_v50 }
 0xbbb   :  { %v1894_v28 = vrot.slane %v1887_v55, %v2783_v50 }
 0xbbc   :  { %v1862_v58 = vcombine.low %v1854_v22, %v1861_v56 }
 0xbbd   :  { %v1902_v57 = vcombine.low %v1894_v28, %v1901_v46 }
 0xbbe   :  { %1903 = vrot.lane.b32.xlu1 %v1862_v58, %s2638_s24 }
 0xbbf   :  { %1905 = vrot.lane.b32.xlu0 %v1902_v57, %s2638_s24 }
 0xc8a   :  { %v1517_v60 = vpop.f32.mrb[40].mxu1 }
 0xc8b   :  { %v1518_v61 = vadd.f32 %v1517_v60, %v2841_v8  ;;  %v2536_v63 = vpop.f32.mrb[41].mxu1 }
 0xc8c   :  { %v1520_v0 = vpop.f32.mrb[42].mxu1  ;;  %v1906_v63 = vpop.permute.xlu0 %1905 }
 0xc8d   :  { %v1523_v1 = vmax.f32 %v1518_v61, 0.0  ;;  %v2537_v2 = vpop.f32.mrb[43].mxu1  ;;  %v1904_v0 = vpop.permute.xlu1 %1903 }
 0xc8f   :  { %1525 = vst.msk [vmem:[#allocation2 + $0xe] sm:$0x3] %vm761_vm5, %v1523_v1 }
 0xc96   :  { %v2613_v6 = vld.sshfl [vmem:[#allocation2 + $0xa] sm:$0xf pattern:$0x76325410] }
 0xc97   :  { %v1565_v25 = vcombine.low %v2613_v6, %v1556_v24 }
 0xc99   :  { %v1572_v62 = vrot.slane %v1565_v25, %v1563_v23 }
 0xc9b   :  { %v1573_v8 = vcombine.low %v1564_v26, %v1572_v62  ;;  %v1574_v9 = vcombine.high %v1564_v26, %v1572_v62  ;;  %v2239_v10 = vcombine.low %v1572_v62, %v1572_v62  ;;  %v2240_v12 = vcombine.high %v1572_v62, %v1572_v62 }
 0xc9d   :  { %v1584_v13 = vrot.slane %v1573_v8, %v2783_v50  ;;  %v1591_v14 = vrot.slane %v2239_v10, %v2783_v50  ;;  %v1632_v18 = vrot.slane %v1574_v9, %v2783_v50  ;;  %v1639_v19 = vrot.slane %v2240_v12, %v2783_v50 }
 0xc9f   :  { %v1592_v16 = vcombine.high %v1584_v13, %v1584_v13  ;;  %v1593_v21 = vcombine.high %v1591_v14, %v1591_v14  ;;  %v1607_v11 = vrot.slane %v1591_v14, %v2783_v50  ;;  %v1640_v27 = vcombine.high %v1632_v18, %v1632_v18 }
 0xca0   :  { %v1648_v29 = vrot.slane %v1632_v18, %v2783_v50  ;;  %v1641_v32 = vcombine.high %v1639_v19, %v1639_v19  ;;  %v1655_v30 = vrot.slane %v1639_v19, %v2783_v50  ;;  %v1600_v31 = vrot.slane %v1584_v13, %v2783_v50 }
 0xca1   :  { %v1614_v33 = vrot.slane %v1592_v16, %v2783_v50  ;;  %v1621_v52 = vrot.slane %v1593_v21, %v2783_v50  ;;  %v1623_v34 = vcombine.high %v1607_v11, %v1607_v11  ;;  %v1662_v36 = vrot.slane %v1640_v27, %v2783_v50 }
 0xca2   :  { %v1670_v35 = vcombine.high %v1648_v29, %v1648_v29  ;;  %v1669_v17 = vrot.slane %v1641_v32, %v2783_v50  ;;  %v1671_v37 = vcombine.high %v1655_v30, %v1655_v30 }
 0xca3   :  { %v1721_v38 = vcombine.low %v1600_v31, %v1614_v33  ;;  %v2241_v39 = vcombine.high %v1600_v31, %v1614_v33  ;;  %v1723_v40 = vcombine.low %v1607_v11, %v1621_v52  ;;  %v1724_v20 = vcombine.low %v1623_v34, %v1648_v29 }
 0xca4   :  { %v1672_v41 = vcombine.high %v1662_v36, %v1662_v36  ;;  %v1770_v42 = vcombine.low %v1662_v36, %v1670_v35  ;;  %v1772_v43 = vcombine.low %v1669_v17, %v1671_v37 }
 0xca5   :  { %v1731_v44 = vrot.slane %v1721_v38, %v2783_v50  ;;  %v1738_v45 = vrot.slane %v2241_v39, %v2783_v50  ;;  %v1745_v47 = vrot.slane %v1723_v40, %v2783_v50  ;;  %v1752_v48 = vrot.slane %v1724_v20, %v2783_v50 }
 0xca6   :  { %v1771_v49 = vcombine.low %v1672_v41, %v1655_v30  ;;  %v1779_v55 = vrot.slane %v1770_v42, %v2783_v50  ;;  %v1793_v53 = vrot.slane %v1772_v43, %v2783_v50 }
 0xca7   :  { %v1753_v51 = vcombine.low %v1731_v44, %v1738_v45  ;;  %v1754_v54 = vcombine.low %v1745_v47, %v1752_v48 }
 0xca8   :  { %v1786_v46 = vrot.slane %v1771_v49, %v2783_v50  ;;  %v1808_v60 = vrot.slane %v1793_v53, %v2783_v50 }
 0xca9   :  { %v1761_v22 = vrot.slane %v1753_v51, %v2783_v50  ;;  %v1768_v28 = vrot.slane %v1754_v54, %v2783_v50 }
 0xcaa   :  { %v1794_v56 = vcombine.low %v1779_v55, %v1786_v46 }
 0xcab   :  { %v1769_v57 = vcombine.low %v1761_v22, %v1768_v28 }
 0xcac   :  { %v1801_v58 = vrot.slane %v1794_v56, %v2783_v50 }
 0xcad   :  { %2546 = vmatprep.mubr.msk.f32.mxu0 %vm566_vm4, %v1769_v57 }
 0xcae   :  { %v1809_v61 = vcombine.low %v1801_v58, %v1808_v60 }
 0xcb0   :  { %2547 = vmatmul.mubr.msk.f32.vlgmr.msra.gmra.mrb[48].mxu0 %vm566_vm4, %v1809_v61 }
 0xd83   :  { %v2548_v1 = vpop.f32.mrb[48].mxu0 }
 0xd84   :  { %v1985_v2 = vadd.f32 %v2548_v1, %v1906_v63  ;;  %v1979_v3 = vpop.f32.mrb[49].mxu0 }
 0xd85   :  { %v1980_v59 = vadd.f32 %v1979_v3, %v1904_v0 }
 0xd86   :  { %v2039_v4 = vcombine.high %v1985_v2, %v1985_v2  ;;  %v2046_v15 = vrot.slane %v1985_v2, %v2783_v50 }
 0xd87   :  { %v1990_v5 = vcombine.high %v1980_v59, %v1980_v59  ;;  %v1997_v6 = vrot.slane %v1980_v59, %v2783_v50 }
 0xd88   :  { %v2053_v7 = vrot.slane %v2039_v4, %v2783_v50  ;;  %v2054_v23 = vcombine.high %v2046_v15, %v2046_v15  ;;  %v2062_v8 = vrot.slane %v2046_v15, %v2783_v50 }
 0xd89   :  { %v2004_v24 = vrot.slane %v1990_v5, %v2783_v50  ;;  %v2005_v25 = vcombine.high %v1997_v6, %v1997_v6  ;;  %v2013_v26 = vrot.slane %v1997_v6, %v2783_v50 }
 0xd8a   :  { %v2055_v62 = vcombine.high %v2053_v7, %v2053_v7  ;;  %v2069_v9 = vrot.slane %v2053_v7, %v2783_v50  ;;  %v2076_v10 = vrot.slane %v2054_v23, %v2783_v50 }
 0xd8b   :  { %v2006_v12 = vcombine.high %v2004_v24, %v2004_v24  ;;  %v2020_v13 = vrot.slane %v2004_v24, %v2783_v50  ;;  %v2027_v14 = vrot.slane %v2005_v25, %v2783_v50  ;;  %v2035_v18 = vcombine.high %v2013_v26, %v2013_v26 }
 0xd8c   :  { %v2083_v19 = vrot.slane %v2055_v62, %v2783_v50  ;;  %v2136_v16 = vcombine.low %v2062_v8, %v2076_v10  ;;  %v2246_v21 = vcombine.high %v2062_v8, %v2076_v10  ;;  %v2086_v11 = vcombine.low %v2013_v26, %v2013_v26 }
 0xd8d   :  { %v2034_v27 = vrot.slane %v2006_v12, %v2783_v50  ;;  %v2036_v29 = vcombine.high %v2020_v13, %v2020_v13  ;;  %v2037_v32 = vcombine.high %v2027_v14, %v2027_v14  ;;  %v2087_v30 = vcombine.low %v2027_v14, %v2035_v18 }
 0xd8e   :  { %v2138_v31 = vcombine.low %v2069_v9, %v2083_v19  ;;  %v2096_v33 = vrot.slane %v2086_v11, %v2783_v50  ;;  %v2152_v17 = vrot.slane %v2136_v16, %v2783_v50  ;;  %v2159_v37 = vrot.slane %v2246_v21, %v2783_v50 }
 0xd8f   :  { %v2088_v52 = vcombine.low %v2037_v32, %v2020_v13  ;;  %v2089_v34 = vcombine.low %v2034_v27, %v2036_v29  ;;  %v2103_v35 = vrot.slane %v2087_v30, %v2783_v50  ;;  %v2245_v36 = vcombine.high %v2034_v27, %v2034_v27 }
 0xd90   :  { %v2166_v38 = vrot.slane %v2138_v31, %v2783_v50 }
 0xd91   :  { %v2110_v39 = vrot.slane %v2088_v52, %v2783_v50  ;;  %v2117_v40 = vrot.slane %v2089_v34, %v2783_v50  ;;  %v2118_v20 = vcombine.low %v2096_v33, %v2103_v35  ;;  %v2145_v41 = vrot.slane %v2245_v36, %v2783_v50 }
 0xd92   :  { %v2168_v42 = vcombine.low %v2159_v37, %v2166_v38 }
 0xd93   :  { %v2119_v43 = vcombine.low %v2110_v39, %v2117_v40  ;;  %v2167_v44 = vcombine.low %v2145_v41, %v2152_v17  ;;  %v2126_v47 = vrot.slane %v2118_v20, %v2783_v50 }
 0xd94   :  { %v2182_v45 = vrot.slane %v2168_v42, %v2783_v50 }
 0xd95   :  { %v2133_v48 = vrot.slane %v2119_v43, %v2783_v50  ;;  %v2175_v49 = vrot.slane %v2167_v44, %v2783_v50 }
 0xd97   :  { %v2134_v51 = vcombine.low %v2126_v47, %v2133_v48  ;;  %v2183_v54 = vcombine.low %v2175_v49, %v2182_v45 }
 0xd99   :  { %v2187_v55 = vsel %vm2186_vm6, 0.0, %v2134_v51  ;;  %v2188_v46 = vsel %vm2186_vm6, 0.0, %v2183_v54 }
 0xd9a   :  { %2189 = vst.msk [vmem:[#allocation3] sm:$0xff] %vm25_vm0, %v2187_v55  ;;  %2190 = vst.msk [vmem:[#allocation3 + $0x8] sm:$0xff] %vm25_vm0, %v2188_v46 }
 0xd9b   :  { %2625 = shalt.err (!%p2622_p4)
}
 0xd9c   :  { %s2626_s8 = scalar_lea.hbm %s3064_s3, 256 }
 0xd9d   :  { %p2627_p5 = scmp.ne.s32.totalorder %s3064_s3, %s2626_s8  ;;  %p2630_p6 = scmp.lt.u32.totalorder %s2626_s8, %s3064_s3 }
 0xd9f   :  { %p2632_p7 = pnand %p2630_p6, %p2627_p5 }
 0xda1   :  { %2635 = shalt.err (!%p2632_p7)
}
 0xda2   :  { %s2647_s13 = smov 128   ;;  %s2648_s14 = smov 8  }
 0xda3   :  { %2202 = dma.vmem_to_hbm [thread:$0]  %s2197_s4, 256, %s3064_s3, [#allocation4], %s2647_s13, %s2647_s13, %s2648_s14  }
 0xda4   :  { %2636 = dma.done.wait [#allocation4], 256  }
 0xda5   :  { %2637 = vsyncadd [#allocation4], 4294967040 }
 0xda6   :  { %2206 = vsyncpa [#allocation4], 1 }

</bundles_post_ra>
